<compile_context>
chip_gen: v7x
topology: tpu7x:2x2x1
jax: 0.10.0
libtpu: 0.0.40
codegen_flags: <defaults>
</compile_context>

<pallas_src>
import functools

import jax
import jax.numpy as jnp
import numpy as np
from jax import lax
from jax.experimental import pallas as pl
from jax.experimental.pallas import tpu as pltpu

_LANES = 128
_MAX_TILE_ROWS = 4096     # 512K pixels per tile -> ~6 MiB per 3-channel f32 input block


def _round_up(x, m):
    return (x + m - 1) // m * m


def _cdiv(a, b):
    return (a + b - 1) // b


def _hpr_kernel(pred_ref, prev_ref, hint_ref,
                cnt_ref, sum_ref, ssq_ref,
                acc_c, acc_s, acc_s2, *,
                jnd_sq, width, n_valid, tile_rows, chunk_rows, tiles_per_split):
    """pred/prev blocks: (1, 3, tile_rows, 128); hint: SMEM (B, 2);
    outputs: (1, 1, 1, 1) resident across the tile axis; acc_*: VMEM (8, 128)."""
    b = pl.program_id(0)
    s = pl.program_id(1)
    t = pl.program_id(2)

    # Resident (8,128) accumulators: zeroed at the start of each (batch, split) series.
    @pl.when(t == 0)
    def _():
        acc_c[...] = jnp.zeros_like(acc_c)
        acc_s[...] = jnp.zeros_like(acc_s)
        acc_s2[...] = jnp.zeros_like(acc_s2)

    g = s * tiles_per_split + t                         # intended global tile id
    tile_base = (g * (tile_rows * _LANES)).astype(jnp.float32)

    hr = hint_ref[b, 0]                                 # scalar reads from SMEM
    hc = hint_ref[b, 1]
    inv_w = 1.0 / width

    # Chunk-local flat index template; computed (and converted) once per tile.
    local = (lax.broadcasted_iota(jnp.int32, (chunk_rows, _LANES), 0) * _LANES
             + lax.broadcasted_iota(jnp.int32, (chunk_rows, _LANES), 1)
             ).astype(jnp.float32)

    n_chunks = tile_rows // chunk_rows
    k = chunk_rows // 8

    def chunk_body(i, carry):
        c_acc, s_acc, s2_acc = carry
        r0 = pl.multiple_of(i * chunk_rows, chunk_rows)
        sl = pl.ds(r0, chunk_rows)

        d0 = pred_ref[0, 0, sl, :] - prev_ref[0, 0, sl, :]
        d1 = pred_ref[0, 1, sl, :] - prev_ref[0, 1, sl, :]
        d2 = pred_ref[0, 2, sl, :] - prev_ref[0, 2, sl, :]
        # LAB per-channel scales [100,110,110] folded into squared constants;
        # threshold on the squared distance (sqrt is monotone, dsq >= 0).
        dsq = d0 * d0 * 10000.0 + (d1 * d1 + d2 * d2) * 12100.0

        idx = tile_base + (i * (chunk_rows * _LANES)).astype(jnp.float32) + local
        row = jnp.floor((idx + 0.5) * inv_w)            # reciprocal multiply
        col = idx - row * width
        dr = row - hr
        dc = col - hc
        dist_sq = dr * dr + dc * dc
        dist = jnp.sqrt(dist_sq)                        # EUP slot, effectively free

        # JND mask AND validity mask (padding / partial-OOB tile rows are gated here).
        m = ((dsq > jnd_sq) & (idx < n_valid)).astype(jnp.float32)
        md = m * dist
        ms2 = m * dist_sq

        # Fold (chunk_rows,128) -> (8,128) with pure VPU adds (static 8-row slabs).
        for j in range(k):
            slab = slice(j * 8, (j + 1) * 8)
            c_acc = c_acc + m[slab, :]
            s_acc = s_acc + md[slab, :]
            s2_acc = s2_acc + ms2[slab, :]
        return c_acc, s_acc, s2_acc

    zero = jnp.zeros((8, _LANES), jnp.float32)
    c_acc, s_acc, s2_acc = lax.fori_loop(0, n_chunks, chunk_body, (zero, zero, zero))

    acc_c[...] += c_acc
    acc_s[...] += s_acc
    acc_s2[...] += s2_acc

    # One XLU reduction + three tiny stores per (batch, split), not per tile.
    @pl.when(t == pl.num_programs(2) - 1)
    def _():
        cnt_ref[...] = jnp.sum(acc_c[...], axis=(0, 1), keepdims=True).reshape(1, 1, 1, 1)
        sum_ref[...] = jnp.sum(acc_s[...], axis=(0, 1), keepdims=True).reshape(1, 1, 1, 1)
        ssq_ref[...] = jnp.sum(acc_s2[...], axis=(0, 1), keepdims=True).reshape(1, 1, 1, 1)


@functools.partial(jax.jit, static_argnames=("jnd", "max_tile_rows", "n_splits"))
def _hpr_stats(pred, prev, hint, jnd=2.3, max_tile_rows=_MAX_TILE_ROWS, n_splits=None):
    B, C, H, W = pred.shape
    assert C == 3, "expects 3-channel (LAB-like) images"
    N = H * W

    # Pad only when W is not lane-aligned, and only up to the next multiple of 1024
    # (rows stays a multiple of 8); ragged tiles are masked in-kernel instead.
    n_pad = N if N % _LANES == 0 else _round_up(N, _LANES * 8)
    rows = n_pad // _LANES

    tile_rows = min(max_tile_rows, _round_up(rows, 8))
    chunk_rows = 64
    while tile_rows % chunk_rows:
        chunk_rows //= 2                                # tile_rows is a multiple of 8
    total_tiles = _cdiv(rows, tile_rows)

    if n_splits is None:      # keep both v7x TensorCores busy for single-image calls
        n_splits = 2 if (B == 1 and total_tiles >= 2) else 1
    tiles_per_split = _cdiv(total_tiles, n_splits)

    pred_f = pred.reshape(B, C, N)
    prev_f = prev.reshape(B, C, N)
    if n_pad != N:
        pad = ((0, 0), (0, 0), (0, n_pad - N))
        pred_f = jnp.pad(pred_f, pad)                   # small, alignment-only pad
        prev_f = jnp.pad(prev_f, pad)
    pred_f = pred_f.reshape(B, C, rows, _LANES)         # free reshape (contiguous)
    prev_f = prev_f.reshape(B, C, rows, _LANES)
    hint_f = hint.astype(jnp.float32)

    kernel = functools.partial(
        _hpr_kernel, jnd_sq=float(jnd) * float(jnd), width=float(W),
        n_valid=float(N), tile_rows=tile_rows, chunk_rows=chunk_rows,
        tiles_per_split=tiles_per_split)

    def img_map(b, s, t):
        # Clamp so a "waste" tile (odd tile count split across 2 cores) never DMAs OOB;
        # its contribution is zeroed by the in-kernel validity mask.
        return (b, 0, jnp.minimum(s * tiles_per_split + t, total_tiles - 1), 0)

    blk = (1, C, tile_rows, _LANES)
    out_shape = tuple(jax.ShapeDtypeStruct((B, n_splits, 1, 1), jnp.float32)
                      for _ in range(3))
    cnt, ssum, ssq = pl.pallas_call(
        kernel,
        out_shape=out_shape,
        grid=(B, n_splits, tiles_per_split),
        in_specs=[
            pl.BlockSpec(blk, img_map),
            pl.BlockSpec(blk, img_map),
            pl.BlockSpec(memory_space=pltpu.MemorySpace.SMEM),
        ],
        out_specs=tuple(pl.BlockSpec((1, 1, 1, 1), lambda b, s, t: (b, s, 0, 0))
                        for _ in range(3)),
        scratch_shapes=[
            pltpu.VMEM((8, _LANES), jnp.float32),
            pltpu.VMEM((8, _LANES), jnp.float32),
            pltpu.VMEM((8, _LANES), jnp.float32),
        ],
        compiler_params=pltpu.CompilerParams(
            dimension_semantics=("parallel", "parallel", "arbitrary"),
            vmem_limit_bytes=48 * 1024 * 1024,
        ),
    )(pred_f, prev_f, hint_f)

    # count / sum / sum-of-squares are additive across the split axis.
    count = cnt.reshape(B, n_splits).sum(axis=1)
    s = ssum.reshape(B, n_splits).sum(axis=1)
    s2 = ssq.reshape(B, n_splits).sum(axis=1)
    return count, s, s2


def hint_propagation_range(pred, prev, hint_coord, n_gt=None, jnd=2.3,
                           max_tile_rows=_MAX_TILE_ROWS, n_splits=None):
    """Returns (dist_mean, dist_std) as jnp scalars, matching the torch forward."""
    B = pred.shape[0]
    n = B if n_gt is None else n_gt
    count, s, s2 = _hpr_stats(pred, prev, jnp.asarray(hint_coord),
                              jnd=jnd, max_tile_rows=max_tile_rows, n_splits=n_splits)
    safe_c = jnp.maximum(count, 1.0)
    mean = jnp.where(count > 0, s / safe_c, 0.0)
    # unbiased (ddof=1) variance via sum / sum-of-squares, as torch.std does
    var = (s2 - (s * s) / safe_c) / jnp.maximum(count - 1.0, 1.0)
    std = jnp.where(count > 1, jnp.sqrt(jnp.maximum(var, 0.0)), 0.0)
    return jnp.sum(mean) / n, jnp.sum(std) / n


class HintPropagationRange:
    """Stateful wrapper mirroring the PyTorch module (prev_img kept on host side)."""

    def __init__(self, jnd=2.3):
        self.jnd = jnd
        self.prev_img = None

    def __call__(self, pred, gt, hint_coord):
        if self.prev_img is None:
            # first call: diff_map is all zeros -> no changed points
            dm, ds = 0.0, 0.0
        else:
            dm, ds = hint_propagation_range(
                pred, self.prev_img, hint_coord, n_gt=gt.shape[0], jnd=self.jnd
            )
            dm, ds = float(dm), float(ds)
        self.prev_img = pred
        return dm, ds

    def flush(self):
        self.prev_img = None


def _reference_hpr(pred, prev, hint, jnd=2.3):
    """Pure numpy port of the torch forward (for correctness check)."""
    pred = np.asarray(pred, np.float32)
    prev = np.asarray(prev, np.float32)
    hint = np.asarray(hint, np.float32)
    scale = np.array([100.0, 110.0, 110.0], np.float32).reshape(1, 3, 1, 1)
    diff = np.sqrt((((pred - prev) * scale) ** 2).sum(1))   # (B, H, W)
    B = pred.shape[0]
    dm, ds = 0.0, 0.0
    for b in range(B):
        pts = np.argwhere(np.abs(diff[b]) > jnd).astype(np.float32)  # (K, 2) row,col
        if len(pts) != 0:
            d = np.sqrt(((pts - hint[b][None, :]) ** 2).sum(1))
            dm += float(d.mean())
            if len(d) > 1:
                ds += float(d.std(ddof=1))
    return dm / B, ds / B


if __name__ == "__main__":
    key = jax.random.PRNGKey(0)

    def make_case(B, H, W, seed):
        k1, k2, k3 = jax.random.split(jax.random.fold_in(key, seed), 3)
        prev = jax.random.uniform(k1, (B, 3, H, W), dtype=jnp.float32)
        pred = prev + 0.05 * jax.random.normal(k2, (B, 3, H, W), dtype=jnp.float32)
        hint = jax.random.randint(k3, (B, 2), 0, min(H, W)).astype(jnp.float32)
        return pred, prev, hint

    # --- case 1: small 16x16 image (W % 128 != 0 -> pad-to-1024 path), single tile;
    # also exercises the stateful class ---
    B, H, W = 2, 16, 16
    pred1, prev1, hint1 = make_case(B, H, W, seed=0)
    gt = jnp.zeros((B, 3, H, W), dtype=jnp.float32)  # only len(gt) is used

    hpr = HintPropagationRange(jnd=2.3)
    dm0, ds0 = hpr(prev1, gt, hint1)     # primes state, returns (0, 0)
    assert dm0 == 0.0 and ds0 == 0.0

    dm_j, ds_j = hint_propagation_range(pred1, prev1, hint1, n_gt=B, jnd=2.3)
    jax.block_until_ready((dm_j, ds_j))
    dm1, ds1 = hpr(pred1, gt, hint1)

    dm_ref, ds_ref = _reference_hpr(pred1, prev1, hint1, jnd=2.3)
    np.testing.assert_allclose(float(dm_j), dm_ref, rtol=1e-2, atol=5e-2)
    np.testing.assert_allclose(float(ds_j), ds_ref, rtol=1e-2, atol=5e-2)
    np.testing.assert_allclose(dm1, dm_ref, rtol=1e-2, atol=5e-2)
    np.testing.assert_allclose(ds1, ds_ref, rtol=1e-2, atol=5e-2)

    # --- case 2: B=1, 200x200 with small tiles -> multi-tile, resident accumulators,
    # and the megacore split axis (S=2) ---
    pred2, prev2, hint2 = make_case(1, 200, 200, seed=1)
    dm_j2, ds_j2 = hint_propagation_range(pred2, prev2, hint2, n_gt=1, jnd=2.3,
                                          max_tile_rows=32)
    jax.block_until_ready((dm_j2, ds_j2))
    dm_ref2, ds_ref2 = _reference_hpr(pred2, prev2, hint2, jnd=2.3)
    np.testing.assert_allclose(float(dm_j2), dm_ref2, rtol=1e-2, atol=5e-2)
    np.testing.assert_allclose(float(ds_j2), ds_ref2, rtol=1e-2, atol=5e-2)

    # --- case 3: odd tile count with a forced split (clamped index_map + fully masked
    # waste tile) ---
    dm_j3, ds_j3 = hint_propagation_range(pred2, prev2, hint2, n_gt=1, jnd=2.3,
                                          max_tile_rows=48, n_splits=2)
    jax.block_until_ready((dm_j3, ds_j3))
    np.testing.assert_allclose(float(dm_j3), dm_ref2, rtol=1e-2, atol=5e-2)
    np.testing.assert_allclose(float(ds_j3), ds_ref2, rtol=1e-2, atol=5e-2)

    # --- case 4: lane-aligned width (W=128 -> no pad, free reshape), B=2 ---
    pred4, prev4, hint4 = make_case(2, 24, 128, seed=2)
    dm_j4, ds_j4 = hint_propagation_range(pred4, prev4, hint4, n_gt=2, jnd=2.3)
    jax.block_until_ready((dm_j4, ds_j4))
    dm_ref4, ds_ref4 = _reference_hpr(pred4, prev4, hint4, jnd=2.3)
    np.testing.assert_allclose(float(dm_j4), dm_ref4, rtol=1e-2, atol=5e-2)
    np.testing.assert_allclose(float(ds_j4), ds_ref4, rtol=1e-2, atol=5e-2)

    print("KERNEL_OK")
</pallas_src>

<mosaic_0001>
module attributes {stable_mosaic.version = 11 : i64} {
  func.func @_hpr_kernel(%arg0: i32, %arg1: i32, %arg2: i32, %arg3: memref<1x3x8x128xf32, #tpu.memory_space<vmem>>, %arg4: memref<1x3x8x128xf32, #tpu.memory_space<vmem>>, %arg5: memref<2x2xf32, #tpu.memory_space<smem>>, %arg6: memref<1x1x1x1xf32, #tpu.memory_space<vmem>>, %arg7: memref<1x1x1x1xf32, #tpu.memory_space<vmem>>, %arg8: memref<1x1x1x1xf32, #tpu.memory_space<vmem>>, %arg9: memref<8x128xf32, #tpu.memory_space<vmem>>, %arg10: memref<8x128xf32, #tpu.memory_space<vmem>>, %arg11: memref<8x128xf32, #tpu.memory_space<vmem>>) attributes {dimension_semantics = [#tpu.dimension_semantics<parallel>, #tpu.dimension_semantics<parallel>, #tpu.dimension_semantics<arbitrary>], iteration_bounds = array<i64: 2, 1, 1>, scalar_prefetch = 0 : i64, scratch_operands = 3 : i64, tpu.core_type = #tpu.core_type<tc>, window_params = [{transform_indices = @transform_0, window_bounds = array<i64: 1, 3, 8, 128>}, {transform_indices = @transform_1, window_bounds = array<i64: 1, 3, 8, 128>}, {transform_indices = @transform_2, window_bounds = array<i64: 2, 2>}, {transform_indices = @transform_3, window_bounds = array<i64: 1, 1, 1, 1>}, {transform_indices = @transform_4, window_bounds = array<i64: 1, 1, 1, 1>}, {transform_indices = @transform_5, window_bounds = array<i64: 1, 1, 1, 1>}]} {
    %c0_i32 = arith.constant 0 : i32
    %0 = arith.cmpi eq, %arg2, %c0_i32 : i32
    %1 = arith.extui %0 : i1 to i32
    %c0_i32_0 = arith.constant 0 : i32
    %2 = arith.cmpi ne, %1, %c0_i32_0 : i32
    scf.if %2 {
      %cst_42 = arith.constant 0.000000e+00 : f32
      %95 = vector.broadcast %cst_42 : f32 to vector<8x128xf32>
      %c0_43 = arith.constant 0 : index
      %c0_44 = arith.constant 0 : index
      %96 = vector.load %arg9[%c0_43, %c0_44] : memref<8x128xf32, #tpu.memory_space<vmem>>, vector<8x128xf32>
      tpu.vector_store %arg9[%c0_43, %c0_44], %95 {strides = array<i32>} : memref<8x128xf32, #tpu.memory_space<vmem>>, vector<8x128xf32>,
      %cst_45 = arith.constant 0.000000e+00 : f32
      %97 = vector.broadcast %cst_45 : f32 to vector<8x128xf32>
      %c0_46 = arith.constant 0 : index
      %c0_47 = arith.constant 0 : index
      %98 = vector.load %arg10[%c0_46, %c0_47] : memref<8x128xf32, #tpu.memory_space<vmem>>, vector<8x128xf32>
      tpu.vector_store %arg10[%c0_46, %c0_47], %97 {strides = array<i32>} : memref<8x128xf32, #tpu.memory_space<vmem>>, vector<8x128xf32>,
      %cst_48 = arith.constant 0.000000e+00 : f32
      %99 = vector.broadcast %cst_48 : f32 to vector<8x128xf32>
      %c0_49 = arith.constant 0 : index
      %c0_50 = arith.constant 0 : index
      %100 = vector.load %arg11[%c0_49, %c0_50] : memref<8x128xf32, #tpu.memory_space<vmem>>, vector<8x128xf32>
      tpu.vector_store %arg11[%c0_49, %c0_50], %99 {strides = array<i32>} : memref<8x128xf32, #tpu.memory_space<vmem>>, vector<8x128xf32>,
    } else {
    }
    %c1_i32 = arith.constant 1 : i32
    %3 = arith.muli %arg1, %c1_i32 : i32
    %4 = arith.addi %3, %arg2 : i32
    %c1024_i32 = arith.constant 1024 : i32
    %5 = arith.muli %4, %c1024_i32 : i32
    %6 = arith.sitofp %5 : i32 to f32
    %7 = arith.index_cast %arg0 : i32 to index
    %c0 = arith.constant 0 : index
    %8 = memref.load %arg5[%7, %c0] : memref<2x2xf32, #tpu.memory_space<smem>>
    %9 = arith.index_cast %arg0 : i32 to index
    %c1 = arith.constant 1 : index
    %10 = memref.load %arg5[%9, %c1] : memref<2x2xf32, #tpu.memory_space<smem>>
    %11 = tpu.iota {dimensions = array<i32: 0>} : vector<8x128xi32>
    %c128_i32 = arith.constant 128 : i32
    %12 = vector.broadcast %c128_i32 : i32 to vector<8x128xi32>
    %13 = arith.muli %11, %12 : vector<8x128xi32>
    %14 = tpu.iota {dimensions = array<i32: 1>} : vector<8x128xi32>
    %15 = arith.addi %13, %14 : vector<8x128xi32>
    %16 = arith.sitofp %15 : vector<8x128xi32> to vector<8x128xf32>
    %cst = arith.constant 0.000000e+00 : f32
    %17 = vector.broadcast %cst : f32 to vector<8x128xf32>
    %c0_i32_1 = arith.constant 0 : i32
    %c8_i32 = arith.constant 8 : i32
    %18 = arith.muli %c0_i32_1, %c8_i32 : i32
    %19 = tpu.assume_multiple %18, 8 : i32
    %c0_2 = arith.constant 0 : index
    %c0_3 = arith.constant 0 : index
    %20 = arith.index_cast %19 : i32 to index
    %c0_4 = arith.constant 0 : index
    %21 = vector.load %arg3[%c0_2, %c0_3, %20, %c0_4] : memref<1x3x8x128xf32, #tpu.memory_space<vmem>>, vector<1x1x8x128xf32>
    %22 = vector.shape_cast %21 : vector<1x1x8x128xf32> to vector<8x128xf32>
    %c0_5 = arith.constant 0 : index
    %c0_6 = arith.constant 0 : index
    %23 = arith.index_cast %19 : i32 to index
    %c0_7 = arith.constant 0 : index
    %24 = vector.load %arg4[%c0_5, %c0_6, %23, %c0_7] : memref<1x3x8x128xf32, #tpu.memory_space<vmem>>, vector<1x1x8x128xf32>
    %25 = vector.shape_cast %24 : vector<1x1x8x128xf32> to vector<8x128xf32>
    %26 = arith.subf %22, %25 : vector<8x128xf32>
    %c0_8 = arith.constant 0 : index
    %c1_9 = arith.constant 1 : index
    %27 = arith.index_cast %19 : i32 to index
    %c0_10 = arith.constant 0 : index
    %28 = vector.load %arg3[%c0_8, %c1_9, %27, %c0_10] : memref<1x3x8x128xf32, #tpu.memory_space<vmem>>, vector<1x1x8x128xf32>
    %29 = vector.shape_cast %28 : vector<1x1x8x128xf32> to vector<8x128xf32>
    %c0_11 = arith.constant 0 : index
    %c1_12 = arith.constant 1 : index
    %30 = arith.index_cast %19 : i32 to index
    %c0_13 = arith.constant 0 : index
    %31 = vector.load %arg4[%c0_11, %c1_12, %30, %c0_13] : memref<1x3x8x128xf32, #tpu.memory_space<vmem>>, vector<1x1x8x128xf32>
    %32 = vector.shape_cast %31 : vector<1x1x8x128xf32> to vector<8x128xf32>
    %33 = arith.subf %29, %32 : vector<8x128xf32>
    %c0_14 = arith.constant 0 : index
    %c2 = arith.constant 2 : index
    %34 = arith.index_cast %19 : i32 to index
    %c0_15 = arith.constant 0 : index
    %35 = vector.load %arg3[%c0_14, %c2, %34, %c0_15] : memref<1x3x8x128xf32, #tpu.memory_space<vmem>>, vector<1x1x8x128xf32>
    %36 = vector.shape_cast %35 : vector<1x1x8x128xf32> to vector<8x128xf32>
    %c0_16 = arith.constant 0 : index
    %c2_17 = arith.constant 2 : index
    %37 = arith.index_cast %19 : i32 to index
    %c0_18 = arith.constant 0 : index
    %38 = vector.load %arg4[%c0_16, %c2_17, %37, %c0_18] : memref<1x3x8x128xf32, #tpu.memory_space<vmem>>, vector<1x1x8x128xf32>
    %39 = vector.shape_cast %38 : vector<1x1x8x128xf32> to vector<8x128xf32>
    %40 = arith.subf %36, %39 : vector<8x128xf32>
    %41 = arith.mulf %26, %26 : vector<8x128xf32>
    %cst_19 = arith.constant 1.000000e+04 : f32
    %42 = vector.broadcast %cst_19 : f32 to vector<8x128xf32>
    %43 = arith.mulf %41, %42 : vector<8x128xf32>
    %44 = arith.mulf %33, %33 : vector<8x128xf32>
    %45 = arith.mulf %40, %40 : vector<8x128xf32>
    %46 = arith.addf %44, %45 : vector<8x128xf32>
    %cst_20 = arith.constant 1.210000e+04 : f32
    %47 = vector.broadcast %cst_20 : f32 to vector<8x128xf32>
    %48 = arith.mulf %46, %47 : vector<8x128xf32>
    %49 = arith.addf %43, %48 : vector<8x128xf32>
    %c1024_i32_21 = arith.constant 1024 : i32
    %50 = arith.muli %c0_i32_1, %c1024_i32_21 : i32
    %51 = arith.sitofp %50 : i32 to f32
    %52 = arith.addf %6, %51 : f32
    %53 = vector.broadcast %52 : f32 to vector<8x128xf32>
    %54 = arith.addf %53, %16 : vector<8x128xf32>
    %cst_22 = arith.constant 5.000000e-01 : f32
    %55 = vector.broadcast %cst_22 : f32 to vector<8x128xf32>
    %56 = arith.addf %54, %55 : vector<8x128xf32>
    %cst_23 = arith.constant 6.250000e-02 : f32
    %57 = vector.broadcast %cst_23 : f32 to vector<8x128xf32>
    %58 = arith.mulf %56, %57 : vector<8x128xf32>
    %59 = math.floor %58 : vector<8x128xf32>
    %cst_24 = arith.constant 1.600000e+01 : f32
    %60 = vector.broadcast %cst_24 : f32 to vector<8x128xf32>
    %61 = arith.mulf %59, %60 : vector<8x128xf32>
    %62 = arith.subf %54, %61 : vector<8x128xf32>
    %63 = vector.broadcast %8 : f32 to vector<8x128xf32>
    %64 = arith.subf %59, %63 : vector<8x128xf32>
    %65 = vector.broadcast %10 : f32 to vector<8x128xf32>
    %66 = arith.subf %62, %65 : vector<8x128xf32>
    %67 = arith.mulf %64, %64 : vector<8x128xf32>
    %68 = arith.mulf %66, %66 : vector<8x128xf32>
    %69 = arith.addf %67, %68 : vector<8x128xf32>
    %70 = math.sqrt %69 : vector<8x128xf32>
    %cst_25 = arith.constant 5.290000e+00 : f32
    %71 = vector.broadcast %cst_25 : f32 to vector<8x128xf32>
    %72 = arith.cmpf ogt, %49, %71 : vector<8x128xf32>
    %cst_26 = arith.constant 2.560000e+02 : f32
    %73 = vector.broadcast %cst_26 : f32 to vector<8x128xf32>
    %74 = arith.cmpf olt, %54, %73 : vector<8x128xf32>
    %75 = arith.andi %72, %74 : vector<8x128xi1>
    %76 = arith.extui %75 : vector<8x128xi1> to vector<8x128xi32>
    %77 = arith.sitofp %76 : vector<8x128xi32> to vector<8x128xf32>
    %78 = arith.mulf %77, %70 : vector<8x128xf32>
    %79 = arith.mulf %77, %69 : vector<8x128xf32>
    %80 = arith.addf %17, %77 : vector<8x128xf32>
    %81 = arith.addf %17, %78 : vector<8x128xf32>
    %82 = arith.addf %17, %79 : vector<8x128xf32>
    %c1_i32_27 = arith.constant 1 : i32
    %c0_28 = arith.constant 0 : index
    %c0_29 = arith.constant 0 : index
    %83 = vector.load %arg9[%c0_28, %c0_29] : memref<8x128xf32, #tpu.memory_space<vmem>>, vector<8x128xf32>
    %84 = arith.addf %83, %80 : vector<8x128xf32>
    %c0_30 = arith.constant 0 : index
    %c0_31 = arith.constant 0 : index
    %85 = vector.load %arg9[%c0_30, %c0_31] : memref<8x128xf32, #tpu.memory_space<vmem>>, vector<8x128xf32>
    tpu.vector_store %arg9[%c0_30, %c0_31], %84 {strides = array<i32>} : memref<8x128xf32, #tpu.memory_space<vmem>>, vector<8x128xf32>,
    %c0_32 = arith.constant 0 : index
    %c0_33 = arith.constant 0 : index
    %86 = vector.load %arg10[%c0_32, %c0_33] : memref<8x128xf32, #tpu.memory_space<vmem>>, vector<8x128xf32>
    %87 = arith.addf %86, %81 : vector<8x128xf32>
    %c0_34 = arith.constant 0 : index
    %c0_35 = arith.constant 0 : index
    %88 = vector.load %arg10[%c0_34, %c0_35] : memref<8x128xf32, #tpu.memory_space<vmem>>, vector<8x128xf32>
    tpu.vector_store %arg10[%c0_34, %c0_35], %87 {strides = array<i32>} : memref<8x128xf32, #tpu.memory_space<vmem>>, vector<8x128xf32>,
    %c0_36 = arith.constant 0 : index
    %c0_37 = arith.constant 0 : index
    %89 = vector.load %arg11[%c0_36, %c0_37] : memref<8x128xf32, #tpu.memory_space<vmem>>, vector<8x128xf32>
    %90 = arith.addf %89, %82 : vector<8x128xf32>
    %c0_38 = arith.constant 0 : index
    %c0_39 = arith.constant 0 : index
    %91 = vector.load %arg11[%c0_38, %c0_39] : memref<8x128xf32, #tpu.memory_space<vmem>>, vector<8x128xf32>
    tpu.vector_store %arg11[%c0_38, %c0_39], %90 {strides = array<i32>} : memref<8x128xf32, #tpu.memory_space<vmem>>, vector<8x128xf32>,
    %c0_i32_40 = arith.constant 0 : i32
    %92 = arith.cmpi eq, %arg2, %c0_i32_40 : i32
    %93 = arith.extui %92 : i1 to i32
    %c0_i32_41 = arith.constant 0 : i32
    %94 = arith.cmpi ne, %93, %c0_i32_41 : i32
    scf.if %94 {
      %c0_42 = arith.constant 0 : index
      %c0_43 = arith.constant 0 : index
      %95 = vector.load %arg9[%c0_42, %c0_43] : memref<8x128xf32, #tpu.memory_space<vmem>>, vector<8x128xf32>
      %96 = vector.shape_cast %95 : vector<8x128xf32> to vector<1x8x128xf32>
      %cst_44 = arith.constant dense<0.000000e+00> : vector<1xf32>
      %97 = vector.multi_reduction <add>, %96, %cst_44 [1, 2] : vector<1x8x128xf32> to vector<1xf32>
      %98 = vector.shape_cast %97 : vector<1xf32> to vector<1x1x1xf32>
      %99 = vector.extract %98[0, 0, 0] : f32 from vector<1x1x1xf32>
      %100 = vector.broadcast %99 : f32 to vector<1x1xf32>
      %101 = vector.shape_cast %100 : vector<1x1xf32> to vector<1x1x1x1xf32>
      %c0_45 = arith.constant 0 : index
      %c0_46 = arith.constant 0 : index
      %c0_47 = arith.constant 0 : index
      %c0_48 = arith.constant 0 : index
      %102 = vector.load %arg6[%c0_45, %c0_46, %c0_47, %c0_48] : memref<1x1x1x1xf32, #tpu.memory_space<vmem>>, vector<1x1x1x1xf32>
      tpu.vector_store %arg6[%c0_45, %c0_46, %c0_47, %c0_48], %101 {strides = array<i32>} : memref<1x1x1x1xf32, #tpu.memory_space<vmem>>, vector<1x1x1x1xf32>,
      %c0_49 = arith.constant 0 : index
      %c0_50 = arith.constant 0 : index
      %103 = vector.load %arg10[%c0_49, %c0_50] : memref<8x128xf32, #tpu.memory_space<vmem>>, vector<8x128xf32>
      %104 = vector.shape_cast %103 : vector<8x128xf32> to vector<1x8x128xf32>
      %cst_51 = arith.constant dense<0.000000e+00> : vector<1xf32>
      %105 = vector.multi_reduction <add>, %104, %cst_51 [1, 2] : vector<1x8x128xf32> to vector<1xf32>
      %106 = vector.shape_cast %105 : vector<1xf32> to vector<1x1x1xf32>
      %107 = vector.extract %106[0, 0, 0] : f32 from vector<1x1x1xf32>
      %108 = vector.broadcast %107 : f32 to vector<1x1xf32>
      %109 = vector.shape_cast %108 : vector<1x1xf32> to vector<1x1x1x1xf32>
      %c0_52 = arith.constant 0 : index
      %c0_53 = arith.constant 0 : index
      %c0_54 = arith.constant 0 : index
      %c0_55 = arith.constant 0 : index
      %110 = vector.load %arg7[%c0_52, %c0_53, %c0_54, %c0_55] : memref<1x1x1x1xf32, #tpu.memory_space<vmem>>, vector<1x1x1x1xf32>
      tpu.vector_store %arg7[%c0_52, %c0_53, %c0_54, %c0_55], %109 {strides = array<i32>} : memref<1x1x1x1xf32, #tpu.memory_space<vmem>>, vector<1x1x1x1xf32>,
      %c0_56 = arith.constant 0 : index
      %c0_57 = arith.constant 0 : index
      %111 = vector.load %arg11[%c0_56, %c0_57] : memref<8x128xf32, #tpu.memory_space<vmem>>, vector<8x128xf32>
      %112 = vector.shape_cast %111 : vector<8x128xf32> to vector<1x8x128xf32>
      %cst_58 = arith.constant dense<0.000000e+00> : vector<1xf32>
      %113 = vector.multi_reduction <add>, %112, %cst_58 [1, 2] : vector<1x8x128xf32> to vector<1xf32>
      %114 = vector.shape_cast %113 : vector<1xf32> to vector<1x1x1xf32>
      %115 = vector.extract %114[0, 0, 0] : f32 from vector<1x1x1xf32>
      %116 = vector.broadcast %115 : f32 to vector<1x1xf32>
      %117 = vector.shape_cast %116 : vector<1x1xf32> to vector<1x1x1x1xf32>
      %c0_59 = arith.constant 0 : index
      %c0_60 = arith.constant 0 : index
      %c0_61 = arith.constant 0 : index
      %c0_62 = arith.constant 0 : index
      %118 = vector.load %arg8[%c0_59, %c0_60, %c0_61, %c0_62] : memref<1x1x1x1xf32, #tpu.memory_space<vmem>>, vector<1x1x1x1xf32>
      tpu.vector_store %arg8[%c0_59, %c0_60, %c0_61, %c0_62], %117 {strides = array<i32>} : memref<1x1x1x1xf32, #tpu.memory_space<vmem>>, vector<1x1x1x1xf32>,
    } else {
    }
    return
  }
  func.func @transform_0(%arg0: i32, %arg1: i32, %arg2: i32) -> (i32, i32, i32, i32) {
    %c1_i32 = arith.constant 1 : i32
    %0 = arith.muli %arg1, %c1_i32 : i32
    %1 = arith.addi %0, %arg2 : i32
    %c0_i32 = arith.constant 0 : i32
    %2 = arith.minsi %1, %c0_i32 : i32
    %c0_i32_0 = arith.constant 0 : i32
    %c0_i32_1 = arith.constant 0 : i32
    %c0_i32_2 = arith.constant 0 : i32
    return %arg0, %c0_i32_0, %2, %c0_i32_1 : i32, i32, i32, i32
  }
  func.func @transform_1(%arg0: i32, %arg1: i32, %arg2: i32) -> (i32, i32, i32, i32) {
    %c1_i32 = arith.constant 1 : i32
    %0 = arith.muli %arg1, %c1_i32 : i32
    %1 = arith.addi %0, %arg2 : i32
    %c0_i32 = arith.constant 0 : i32
    %2 = arith.minsi %1, %c0_i32 : i32
    %c0_i32_0 = arith.constant 0 : i32
    %c0_i32_1 = arith.constant 0 : i32
    %c0_i32_2 = arith.constant 0 : i32
    return %arg0, %c0_i32_0, %2, %c0_i32_1 : i32, i32, i32, i32
  }
  func.func @transform_2(%arg0: i32, %arg1: i32, %arg2: i32) -> (i32, i32) {
    %c0_i32 = arith.constant 0 : i32
    %c0_i32_0 = arith.constant 0 : i32
    %c0_i32_1 = arith.constant 0 : i32
    return %c0_i32, %c0_i32_0 : i32, i32
  }
  func.func @transform_3(%arg0: i32, %arg1: i32, %arg2: i32) -> (i32, i32, i32, i32) {
    %c0_i32 = arith.constant 0 : i32
    %c0_i32_0 = arith.constant 0 : i32
    %c0_i32_1 = arith.constant 0 : i32
    return %arg0, %arg1, %c0_i32, %c0_i32_0 : i32, i32, i32, i32
  }
  func.func @transform_4(%arg0: i32, %arg1: i32, %arg2: i32) -> (i32, i32, i32, i32) {
    %c0_i32 = arith.constant 0 : i32
    %c0_i32_0 = arith.constant 0 : i32
    %c0_i32_1 = arith.constant 0 : i32
    return %arg0, %arg1, %c0_i32, %c0_i32_0 : i32, i32, i32, i32
  }
  func.func @transform_5(%arg0: i32, %arg1: i32, %arg2: i32) -> (i32, i32, i32, i32) {
    %c0_i32 = arith.constant 0 : i32
    %c0_i32_0 = arith.constant 0 : i32
    %c0_i32_1 = arith.constant 0 : i32
    return %arg0, %arg1, %c0_i32, %c0_i32_0 : i32, i32, i32, i32
  }
}

</mosaic_0001>

<bundles_post_ra>
// kernel: _hpr_stats.1
= control target key start
LH: loop header
LB: loop body
LE: loop exit
PB: predicated region body
PF: predicated region fallthrough
CT: control target
= control target key end

     0   :  { %11 = vsyncpa [#allocation8], 0  ;;  %s1103_s18 = smov 0   ;;  %s1105_s19 = smov 0   ;;  %s1211_s0 = inlined_call_operand.vmem [shape: f32[2,3,2,128], index: 0, kind: input, shape index: {}]   ;;  %s1212_s1 = inlined_call_operand.vmem [shape: f32[2,3,2,128], index: 1, kind: input, shape index: {}]   ;;  %s1213_s2 = inlined_call_operand.vmem [shape: f32[2,2], index: 2, kind: input, shape index: {}]   ;;  %s1214_s3 = inlined_call_operand.vmem [shape: f32[2,1,1,1], index: 3, kind: output, shape index: {0}]   ;;  %s1215_s4 = inlined_call_operand.vmem [shape: f32[2,1,1,1], index: 4, kind: output, shape index: {1}]   ;;  %s1216_s5 = inlined_call_operand.vmem [shape: f32[2,1,1,1], index: 5, kind: output, shape index: {2}]  }
   0x1   :  { %s1107_s20 = smov 0   ;;  %s1109_s21 = smov 0  }
   0x2   :  { %s1111_s22 = smov 0  }
   0x3 LB: > { %s822_s23 = sadd.s32 4294967295, %s1061_s22   ;;  %s36_s24 = sadd.s32 1, %s1057_s21  ;;  %s1061_s22 = sphi %s1111_s22, %s17_s22   ;;  %s1057_s21 = sphi %s1109_s21, %s1223_s21   ;;  %s1053_s20 = sphi %s1107_s20, %s1222_s20   ;;  %s1049_s19 = sphi %s1105_s19, %s1221_s19   ;;  %s1045_s18 = sphi %s1103_s18, %s1220_s18  }
   0x4   : > { %p38_p0 = scmp.ge.s32.totalorder %s36_s24, 2  ;;  %s51_s25 = sadd.s32 1, %s1049_s19 }
   0x5   : > { %p58_p1 = scmp.ne.s32.totalorder %s1049_s19, %s1045_s18  ;;  %p59_p2 = scmp.eq.s32.totalorder %s1061_s22, 0 }
   0x6   : > { %s1225_s24 = smov (%p38_p0, %s36_s24), 0  ;;  %p824_p4 = scmp.ge.s32.totalorder %s1061_s22, 1 }
   0x7   : > { %p1136_p3 = por %p59_p2, %p58_p1  ;;  %s46_s27 = ssub.s32 %s1057_s21, %s1225_s24 }
   0x8   : > { %p214_p5 = scmp.lt.s32.totalorder %s1061_s22, 3  ;;  %p49_p6 = scmp.eq.s32.totalorder %s46_s27, 0 }
   0x9   : > { %p1148_p8 = scmp.eq.s32.totalorder %s822_s23, 0  ;;  %s227_s8 = sshll.u32 %s1213_s2, 4  ;;  %s228_s8 = int_to_ptr.vmem [resolvable:$true] %s227_s8 }
   0xa   : > { %p1144_p7 = pnand %p824_p4, %p214_p5  ;;  %s972_s9 = scalar_lea.vmem %s228_s8, 32 }
   0xb   : > { %s1153_s30 = scalar_select %p49_p6, %s1049_s19, %s51_s25  }
   0xc   : > { %p858_p9 = pneg %p1144_p7  ;;  %p973_p11 = scmp.ne.s32.totalorder %s228_s8, %s972_s9 }
   0xd   : > { %p980_p1 = scmp.lt.s32.totalorder %s228_s8, %s228_s8  ;;  %p981_p2 = scmp.lt.s32.totalorder %s972_s9, %s972_s9 }
   0xe   : > { %p859_p10 = pnand %p1148_p8, %p858_p9 }
   0xf   : > { %p982_p4 = por %p981_p2, %p980_p1 }
  0x10   : > { %p974_p12 = pneg %p859_p10 }
  0x12   : > { %p975_p13 = pnand %p974_p12, %p973_p11 }
  0x14   : > { %p976_p0 = pneg %p975_p13 }
  0x16   : > { %p983_p5 = pnand %p982_p4, %p976_p0 }
  0x18   : > { %986 = shalt.err (!%p983_p5)
}
  0x19   : > { %s1071_s10 = smov [#allocation7]   ;;  %p826_p6 = scmp.ge.s32.totalorder %s1061_s22, 2 }
  0x1a   : > { %861 = dma.vmem_to_smem (!%p859_p10), %s228_s8, 32, %s1071_s10, [#allocation8]  }
  0x1b   : > { %234 = sbr.rel (%p826_p6) target bundleno = 70 (0x46), region = 20 }
  0x22   : > { %237 = sbr.rel (!%p1136_p3) target bundleno = 52 (0x34), region = 24  ;;  %s239_s11 = sand.u32 (%p1136_p3), 1, %s1049_s19  }
  0x23   : > { %s844_s12 = smul.u32 (%p1136_p3), 6, %s1057_s21  ;;  %s1063_s23 = smov (%p1136_p3), 0  }
  0x24   : > { %s843_s13 = smul.u32 (%p1136_p3), 24, %s239_s11 }
  0x25   : > { %s252_s16 = scalar_lea.vmem (%p1136_p3), %s1211_s0, %s844_s12  }
  0x26   : > { %s241_s17 = scalar_lea.vmem (%p1136_p3), [#allocation5], %s843_s13  }
  0x29 LB: >> { %v270_v0 = vld [vmem:[%s252_s16] sm:$0x3]  ;;  %v272_v1 = vld [vmem:[%s252_s16 + $0x2] sm:$0x3]  ;;  %v274_v2 = vld [vmem:[%s252_s16 + $0x4] sm:$0x3]  ;;  %s1065_s23 = sphi %s1063_s23, %s264_s23  }
  0x2a   : >> { %271 = vst [vmem:[%s241_s17] sm:$0x3] %v270_v0  ;;  %273 = vst [vmem:[%s241_s17 + $0x8] sm:$0x3] %v272_v1  ;;  %s264_s23 = sadd.s32 1, %s1065_s23  }
  0x2b   : >> { %275 = vst [vmem:[%s241_s17 + $0x10] sm:$0x3] %v274_v2  ;;  %p263_p9 = scmp.ge.s32.totalorder %s264_s23, 1 }
  0x2d   : > { %266 = sbr.rel (!%p263_p9) target bundleno = 41 (0x29), region = 184 }
  0x34 PF: > { %311 = sbr.rel (!%p1136_p3) target bundleno = 70 (0x46), region = 58  ;;  %s313_s25 = sand.u32 (%p1136_p3), 1, %s1049_s19  }
  0x35   : > { %s846_s27 = smul.u32 (%p1136_p3), 6, %s1057_s21  ;;  %s1067_s11 = smov (%p1136_p3), 0  }
  0x36   : > { %s845_s6 = smul.u32 (%p1136_p3), 24, %s313_s25 }
  0x37   : > { %s326_s9 = scalar_lea.vmem (%p1136_p3), %s1212_s1, %s846_s27  }
  0x38   : > { %s315_s10 = scalar_lea.vmem (%p1136_p3), [#allocation6], %s845_s6  }
  0x3b LB: >> { %v344_v3 = vld [vmem:[%s326_s9] sm:$0x3]  ;;  %v346_v4 = vld [vmem:[%s326_s9 + $0x2] sm:$0x3]  ;;  %v348_v5 = vld [vmem:[%s326_s9 + $0x4] sm:$0x3]  ;;  %s1069_s11 = sphi %s1067_s11, %s338_s11  }
  0x3c   : >> { %345 = vst [vmem:[%s315_s10] sm:$0x3] %v344_v3  ;;  %347 = vst [vmem:[%s315_s10 + $0x8] sm:$0x3] %v346_v4  ;;  %s338_s11 = sadd.s32 1, %s1069_s11  }
  0x3d   : >> { %349 = vst [vmem:[%s315_s10 + $0x10] sm:$0x3] %v348_v5  ;;  %p337_p3 = scmp.ge.s32.totalorder %s338_s11, 1 }
  0x3f   : > { %340 = sbr.rel (!%p337_p3) target bundleno = 59 (0x3b), region = 195 }
  0x46 PF: > { %388 = sbr.rel (%p1144_p7) target bundleno = 330 (0x14a), region = 92  ;;  %s391_s26 = sand.u32 (!%p1144_p7), 1, %s1045_s18  }
  0x47   : > { %s847_s12 = smul.u32 (!%p1144_p7), 24, %s391_s26 }
  0x49   : > { %s393_s13 = scalar_lea.vmem (!%p1144_p7), [#allocation5], %s847_s12  ;;  %s400_s14 = scalar_lea.vmem (!%p1144_p7), [#allocation6], %s847_s12 }
  0x4d   : > { %1040 = dma.done.wait (%p1148_p8), [#allocation8], 32  }
  0x4e   : > { %1042 = vsyncadd (%p1148_p8), [#allocation8], 4294967264 }
  0x4f   : > { %408 = sfence }
  0x50   : > { %v491_v6 = vlaneseq  ;;  %v498_v7 = vld [vmem:[%s393_s13] sm:$0xff]  ;;  %v499_v8 = vld [vmem:[%s400_s14] sm:$0xff]  ;;  %v836_v9 = vld [vmem:[%s393_s13 + $0x8] sm:$0xff]  ;;  %s835_s18 = sshll.u32 %s1053_s20, 7  ;;  %v1072_v31 = vmov 0.0   ;;  %p459_p7 = scmp.lt.s32.totalorder %s1053_s20, 1 }
  0x51   : > { %v500_v10 = vsub.f32 %v498_v7, %v499_v8  ;;  %v837_v11 = vld [vmem:[%s400_s14 + $0x8] sm:$0xff]  ;;  %v838_v12 = vld [vmem:[%s393_s13 + $0x10] sm:$0xff]  ;;  %v839_v13 = vld [vmem:[%s400_s14 + $0x10] sm:$0xff]  ;;  %s488_s28 = sld [smem:[#allocation7 + %s835_s18]]  ;;  %s489_s29 = sadd.s32 1, %s835_s18  ;;  %vm575_vm5 = vcmask 0  }
  0x52   : > { %v492_v14 = vshrl.u32 %v491_v6, 7  ;;  %v495_v15 = vand.u32 127, %v491_v6  ;;  %v506_v16 = vsub.f32 %v836_v9, %v837_v11  ;;  %v512_v17 = vsub.f32 %v838_v12, %v839_v13  ;;  %s490_s15 = sld [smem:[#allocation7 + %s489_s29]]  ;;  %s1227_s20 = smov (!%p459_p7, %s1053_s20), 1 }
  0x53   : > { %v513_v18 = vmul.f32 %v500_v10, %v500_v10  ;;  %s464_s23 = scalar_lea.vmem %s1214_s3, %s1227_s20  ;;  %s470_s7 = scalar_lea.vmem %s1215_s4, %s1227_s20 }
  0x54   : > { %v493_v19 = vmul.u32 128, %v492_v14  ;;  %v515_v20 = vmul.f32 %v506_v16, %v506_v16  ;;  %v516_v21 = vmul.f32 %v512_v17, %v512_v17  ;;  %s476_s11 = scalar_lea.vmem %s1216_s5, %s1227_s20 }
  0x55   : > { %v514_v23 = vmul.f32 10000.0, %v513_v18 }
  0x56   : > { %v496_v22 = vadd.s32 %v495_v15, %v493_v19  ;;  %v517_v24 = vadd.f32 %v516_v21, %v515_v20 }
  0x57   : > { %v528_v30 = vstv %s488_s28 }
  0x58   : > { %v497_v25 = vcvt.s32.f32 %v496_v22  ;;  %v518_v26 = vmul.f32 12100.0, %v517_v24  ;;  %v530_v36 = vstv %s490_s15 }
  0x5a   : > { %v519_v27 = vadd.f32 %v518_v26, %v514_v23  ;;  %vm543_vm0 = vcmp.lt.f32.partialorder %v497_v25, 256.0  ;;  %v523_v28 = vadd.f32 0.5, %v497_v25 }
  0x5c   : > { %vm542_vm1 = vcmp.gt.f32.partialorder %v519_v27, 5.29  ;;  %v524_v29 = vmul.f32 0.0625, %v523_v28 }
  0x5d   : > { %vm544_vm2 = vmand %vm542_vm1, %vm543_vm0 }
  0x5e   : > { %v840_v32 = vsel %vm544_vm2, 1.0, %v1072_v31  ;;  %v525_v33 = vfloor.f32 %v524_v29 }
  0x5f   : > { %565 = vadd.xlane.f32.xlu0 %v840_v32 }
  0x60   : > { %v526_v34 = vmul.f32 16.0, %v525_v33  ;;  %v529_v35 = vsub.f32 %v525_v33, %v528_v30 }
  0x62   : > { %v527_v37 = vsub.f32 %v497_v25, %v526_v34  ;;  %v532_v39 = vmul.f32 %v529_v35, %v529_v35 }
  0x64   : > { %v531_v38 = vsub.f32 %v527_v37, %v530_v36 }
  0x66   : > { %v533_v40 = vmul.f32 %v531_v38, %v531_v38 }
  0x68   : > { %v534_v41 = vadd.f32 %v533_v40, %v532_v39 }
  0x6a   : > { %v548_v42 = vmul.f32 %v840_v32, %v534_v41  ;;  %970 = vrsqrt.f32 %v534_v41  ;;  %vm537_vm3 = vcmp.eq.f32.partialorder %v534_v41, inf  ;;  %v540_v44 = vand.u32 2147483648, %v534_v41 }
  0x6b   : > { %vm539_vm4 = vcmp.eq.f32.partialorder %v534_v41, 0.0 }
  0x6c   : > { %590 = vadd.xlane.f32.xlu1 %v548_v42 }
  0x74   : > { %v971_v43 = vpop.eup %970 }
  0x75   : > { %v536_v45 = vmul.f32 %v971_v43, %v534_v41 }
  0x77   : > { %v538_v46 = vsel %vm537_vm3, %v534_v41, %v536_v45 }
  0x78   : > { %v541_v47 = vsel %vm539_vm4, %v540_v44, %v538_v46 }
  0x79   : > { %v547_v48 = vmul.f32 %v840_v32, %v541_v47 }
  0x7b   : > { %578 = vadd.xlane.f32.xlu0 %v547_v48 }
  0xec   : > { %v566_v49 = vpop.xlane.xlu0 %565 }
  0xed   : > { %v567_v50 = vrot.slane %v566_v49, 4 }
  0xef   : > { %v568_v51 = vadd.f32 %v567_v50, %v566_v49 }
  0xf1   : > { %v569_v52 = vrot.slane %v568_v51, 2 }
  0xf3   : > { %v570_v53 = vadd.f32 %v569_v52, %v568_v51 }
  0xf5   : > { %v571_v54 = vrot.slane %v570_v53, 1 }
  0xf7   : > { %v572_v55 = vadd.f32 %v571_v54, %v570_v53 }
  0xf9   : > { %848 = vpush %v572_v55  ;;  %v591_v56 = vpop.xlane.xlu1 %590 }
  0xfa   : > { %v592_v57 = vrot.slane %v591_v56, 4 }
  0xfc   : > { %v593_v58 = vadd.f32 %v592_v57, %v591_v56 }
  0xfe   : > { %v594_v59 = vrot.slane %v593_v58, 2 }
 0x100   : > { %v595_v63 = vadd.f32 %v594_v59, %v593_v58 }
 0x102   : > { %v596_v2 = vrot.slane %v595_v63, 1 }
 0x104   : > { %v597_v5 = vadd.f32 %v596_v2, %v595_v63 }
 0x108   : > { %v579_v60 = vpop.xlane.xlu0 %578 }
 0x109   : > { %v580_v61 = vrot.slane %v579_v60, 4 }
 0x10b   : > { %v581_v62 = vadd.f32 %v580_v61, %v579_v60 }
 0x10d   : > { %v582_v0 = vrot.slane %v581_v62, 2 }
 0x10f   : > { %v583_v1 = vadd.f32 %v582_v0, %v581_v62 }
 0x111   : > { %v584_v3 = vrot.slane %v583_v1, 1 }
 0x113   : > { %v585_v4 = vadd.f32 %v584_v3, %v583_v1 }
 0x115   : > { %850 = vpush %v585_v4 }
 0x116   : > { %852 = vpush %v597_v5 }
 0x12a   : > { %s849_s25 = spop %848 }
 0x12b   : > { %v574_v6 = vstv %s849_s25 }
 0x12c   : > { %576 = vst.msk [vmem:[%s464_s23] sm:$0x1] %vm575_vm5, %v574_v6 }
 0x146   : > { %s851_s8 = spop %850 }
 0x147   : > { %v587_v7 = vstv %s851_s8  ;;  %s853_s26 = spop %852 }
 0x148   : > { %588 = vst.msk [vmem:[%s470_s7] sm:$0x1] %vm575_vm5, %v587_v7  ;;  %v599_v8 = vstv %s853_s26 }
 0x149   : > { %600 = vst.msk [vmem:[%s476_s11] sm:$0x1] %vm575_vm5, %v599_v8 }
 0x14a PF: > { %s17_s22 = sadd.s32 1, %s1061_s22   ;;  %s1220_s18 = smov %s1049_s19 }
 0x14b   : > { %p14_p8 = scmp.ge.s32.totalorder %s17_s22, 4   ;;  %s1221_s19 = smov %s1153_s30 }
 0x14c   : > { %s1222_s20 = smov %s1057_s21  ;;  %s1223_s21 = smov %s1225_s24 }
 0x14d   :  { %16 = sbr.rel (!%p14_p8) target bundleno = 3 (0x3), region = 206 }
 0x154   :  { %660 = vsyncpa [#allocation8], 1 }
 0x155   :  { %662 = vsyncpa [#allocation8 + $0x1], 1 }

</bundles_post_ra>
